<compile_context>
chip_gen: v6e
topology: v6e:2x2x1
jax: 0.10.0
libtpu: 0.0.40
codegen_flags: <defaults>
</compile_context>

<pallas_src>
import functools

import jax
import jax.numpy as jnp
from jax.experimental import pallas as pl
from jax.experimental.pallas import tpu as pltpu

_LANE = 128


def _round_up(n, m=_LANE):
    return ((n + m - 1) // m) * m


# --------------------------------------------------------------------------- kernel

def fused_kernel(xc_ref, wc_ref, bc_ref,
                 g_ref, wcomb_ref, bcomb_ref, wfc_ref, bfc_ref,
                 srl_o_ref, head_o_ref):
    """Fused SRL conv + (GCN -> 1-step LSTM -> fc) head.

    SRL : xc (B*T, 3*Cin) im2col input, wc (3*Cin, Cout_pad), bc (1, Cout_pad)
          -> srl_o (B*T, Cout_pad) = relu(xc @ wc + bc)          [lane-dense store]
    Head: g (B, Gin), wcomb (Gin, 3*Lp), bcomb (1, 3*Lp), wfc (Lp, NC_pad),
          bfc (1, NC_pad) -> head_o (B, NC_pad)                  [lane-dense store]
          Gate layout: [i | g | o], each padded to its own Lp = 128-lane slab so
          all slices below are vreg-aligned.
    """
    # ---- SRL branch: Conv1d(k=3, pad=1) + ReLU as ONE MXU matmul.
    srl = jnp.dot(xc_ref[...], wc_ref[...], preferred_element_type=jnp.float32)
    srl_o_ref[...] = jnp.maximum(srl + bc_ref[...], 0.0)

    # ---- Head branch: gates = g @ W_comb + b_comb (GCN linear pre-folded,
    #      f-gate dropped).  Slices are at 128-lane boundaries.
    lp = wfc_ref.shape[0]                                   # padded gate width (128k)
    gates = jnp.dot(g_ref[...], wcomb_ref[...],
                    preferred_element_type=jnp.float32) + bcomb_ref[...]
    i_g = jax.nn.sigmoid(gates[:, 0 * lp:1 * lp])           # input gate   (EUP)
    g_g = jnp.tanh(gates[:, 1 * lp:2 * lp])                 # cell gate    (EUP)
    o_g = jax.nn.sigmoid(gates[:, 2 * lp:3 * lp])           # output gate  (EUP)
    h = o_g * jnp.tanh(i_g * g_g)                           # c0 = 0 -> c1 = i*g
    head_o_ref[...] = jnp.dot(h, wfc_ref[...],
                              preferred_element_type=jnp.float32) + bfc_ref[...]


# --------------------------------------------------------------------------- wrapper

_VMEM = pl.BlockSpec(memory_space=pltpu.MemorySpace.VMEM)


@functools.partial(jax.jit, static_argnames=("srl_hidden", "num_classes"))
def dual_temporal_graph_learning(params, raw_bold_signals, coarsened_graphs,
                                 *, srl_hidden, num_classes):
    B, T, Cin = raw_bold_signals.shape
    cout_pad = params["conv_w"].shape[-1]
    nc_pad = params["fc_w"].shape[-1]

    # im2col for Conv1d(k=3, pad=1): column block k holds x[:, t+k-1, :] (zeros OOB).
    # Layout plumbing in the jitted wrapper so the kernel sees one K = 3*Cin matmul.
    xp = jnp.pad(raw_bold_signals, ((0, 0), (1, 1), (0, 0)))
    xc = jnp.concatenate([xp[:, 0:T], xp[:, 1:T + 1], xp[:, 2:T + 2]], axis=-1)
    xc = xc.reshape(B * T, 3 * Cin)

    srl_flat, head_pad = pl.pallas_call(
        fused_kernel,
        out_shape=(jax.ShapeDtypeStruct((B * T, cout_pad), jnp.float32),
                   jax.ShapeDtypeStruct((B, nc_pad), jnp.float32)),
        in_specs=[_VMEM] * 8,
        out_specs=(_VMEM, _VMEM),
    )(xc, params["conv_w"], params["conv_b"],
      coarsened_graphs, params["w_comb"], params["b_comb"],
      params["fc_w"], params["fc_b"])

    srl_out = srl_flat.reshape(B, T, cout_pad)[:, :, :srl_hidden]
    gcn_out = head_pad[:, :num_classes]
    # The PyTorch forward returns only gcn_out; srl_out is computed (as in the
    # module) and returned here too for verification.
    return gcn_out, srl_out


# --------------------------------------------------------------------------- params

def init_raw_params(key, srl_in, srl_hid, gcn_in, gcn_hid, lstm_hid, num_classes):
    """Raw (pre-transposed to (in, out) / (K, Cin, Cout)) parameters."""
    ks = jax.random.split(key, 10)
    s = 0.1
    return dict(
        conv_w=s * jax.random.normal(ks[0], (3, srl_in, srl_hid), jnp.float32),
        conv_b=s * jax.random.normal(ks[1], (1, srl_hid), jnp.float32),
        gcn_w=s * jax.random.normal(ks[2], (gcn_in, gcn_hid), jnp.float32),
        gcn_b=s * jax.random.normal(ks[3], (1, gcn_hid), jnp.float32),
        lstm_w_ih=s * jax.random.normal(ks[4], (gcn_hid, 4 * lstm_hid), jnp.float32),
        b_ih=s * jax.random.normal(ks[5], (1, 4 * lstm_hid), jnp.float32),
        b_hh=s * jax.random.normal(ks[6], (1, 4 * lstm_hid), jnp.float32),
        fc_w=s * jax.random.normal(ks[7], (lstm_hid, num_classes), jnp.float32),
        fc_b=s * jax.random.normal(ks[8], (1, num_classes), jnp.float32),
    )


def fold_params(raw, srl_hid, lstm_hid, num_classes):
    """Host-side algebraic folds + lane-dense zero padding for the kernel."""
    srl_in = raw["conv_w"].shape[1]
    gcn_in = raw["gcn_w"].shape[0]

    # (a) im2col conv weight (3, Cin, Cout) -> (3*Cin, Cout), zero-pad Cout -> 128k.
    cout_pad = _round_up(srl_hid)
    conv_w_cat = raw["conv_w"].reshape(3 * srl_in, srl_hid)
    conv_w = jnp.zeros((3 * srl_in, cout_pad), jnp.float32).at[:, :srl_hid].set(conv_w_cat)
    conv_b = jnp.zeros((1, cout_pad), jnp.float32).at[:, :srl_hid].set(raw["conv_b"])

    # (b) keep only the i, g, o gates (f-gate multiplies c0 == 0) and fold the
    #     GCN linear into the gate matmul (exact: both maps are affine).
    #     PyTorch gate order in W_ih is [i | f | g | o].
    #     Each kept gate gets its own 128-lane slab so kernel slices are vreg-aligned.
    L = lstm_hid
    lp = _round_up(L)
    w_ih = raw["lstm_w_ih"]
    b_gate = raw["b_ih"] + raw["b_hh"]                 # W_hh @ h0 == 0, biases survive
    gate_idx = (0, 2, 3)                               # i, g, o
    w_comb = jnp.zeros((gcn_in, 3 * lp), jnp.float32)
    b_comb = jnp.zeros((1, 3 * lp), jnp.float32)
    for slot, gi in enumerate(gate_idx):
        wg = raw["gcn_w"] @ w_ih[:, gi * L:(gi + 1) * L]           # (Gin, L)
        bg = raw["gcn_b"] @ w_ih[:, gi * L:(gi + 1) * L] + b_gate[:, gi * L:(gi + 1) * L]
        w_comb = w_comb.at[:, slot * lp:slot * lp + L].set(wg)
        b_comb = b_comb.at[:, slot * lp:slot * lp + L].set(bg)

    # (c) zero-pad the fc weight: rows to the padded gate width (padded h cols are 0),
    #     output width to a lane-dense slab; wrapper slices it back.
    nc_pad = _round_up(num_classes)
    fc_w = jnp.zeros((lp, nc_pad), jnp.float32).at[:L, :num_classes].set(raw["fc_w"])
    fc_b = jnp.zeros((1, nc_pad), jnp.float32).at[:, :num_classes].set(raw["fc_b"])

    return dict(conv_w=conv_w, conv_b=conv_b,
                w_comb=w_comb, b_comb=b_comb,
                fc_w=fc_w, fc_b=fc_b)


# --------------------------------------------------------------------------- reference

def reference_forward(raw, x, g):
    """Pure-JAX reference of the PyTorch module (unfolded parameters)."""
    B, T, _ = x.shape
    xp = jnp.pad(x, ((0, 0), (1, 1), (0, 0)))
    srl = sum(jnp.einsum("btc,cd->btd", xp[:, k:k + T], raw["conv_w"][k])
              for k in range(3))
    srl = jnp.maximum(srl + raw["conv_b"], 0.0)

    gcn = g @ raw["gcn_w"] + raw["gcn_b"]
    gates = gcn @ raw["lstm_w_ih"] + raw["b_ih"] + raw["b_hh"]
    L = raw["fc_w"].shape[0]
    i = jax.nn.sigmoid(gates[:, 0 * L:1 * L])
    gg = jnp.tanh(gates[:, 2 * L:3 * L])
    o = jax.nn.sigmoid(gates[:, 3 * L:4 * L])
    h = o * jnp.tanh(i * gg)                     # c0 = 0, h0 = 0
    out = h @ raw["fc_w"] + raw["fc_b"]
    return out, srl


# --------------------------------------------------------------------------- main

if __name__ == "__main__":
    B, T = 2, 8
    srl_input_size, srl_hidden_size = 4, 16
    gcn_input_size, gcn_hidden_size = 16, 32
    lstm_hidden_size, num_classes = 32, 8

    key = jax.random.PRNGKey(0)
    kp, kx, kg = jax.random.split(key, 3)
    raw = init_raw_params(kp, srl_input_size, srl_hidden_size,
                          gcn_input_size, gcn_hidden_size,
                          lstm_hidden_size, num_classes)
    params = fold_params(raw, srl_hidden_size, lstm_hidden_size, num_classes)

    raw_bold_signals = jax.random.normal(kx, (B, T, srl_input_size), jnp.float32)
    coarsened_graphs = jax.random.normal(kg, (B, gcn_input_size), jnp.float32)

    gcn_out, srl_out = dual_temporal_graph_learning(
        params, raw_bold_signals, coarsened_graphs,
        srl_hidden=srl_hidden_size, num_classes=num_classes)
    jax.block_until_ready(gcn_out)
    jax.block_until_ready(srl_out)

    assert gcn_out.shape == (B, num_classes)
    assert srl_out.shape == (B, T, srl_hidden_size)

    # Correctness vs pure-JAX reference of the original module.
    ref_gcn, ref_srl = reference_forward(raw, raw_bold_signals, coarsened_graphs)
    assert jnp.allclose(gcn_out, ref_gcn, rtol=1e-2, atol=1e-2), "head mismatch"
    assert jnp.allclose(srl_out, ref_srl, rtol=1e-2, atol=1e-2), "SRL mismatch"

    print("KERNEL_OK")
</pallas_src>

<mosaic_0001>
module attributes {stable_mosaic.version = 11 : i64} {
  func.func @fused_kernel(%arg0: memref<16x12xf32, #tpu.memory_space<vmem>>, %arg1: memref<12x128xf32, #tpu.memory_space<vmem>>, %arg2: memref<1x128xf32, #tpu.memory_space<vmem>>, %arg3: memref<2x16xf32, #tpu.memory_space<vmem>>, %arg4: memref<16x384xf32, #tpu.memory_space<vmem>>, %arg5: memref<1x384xf32, #tpu.memory_space<vmem>>, %arg6: memref<128x128xf32, #tpu.memory_space<vmem>>, %arg7: memref<1x128xf32, #tpu.memory_space<vmem>>, %arg8: memref<16x128xf32, #tpu.memory_space<vmem>>, %arg9: memref<2x128xf32, #tpu.memory_space<vmem>>) attributes {dimension_semantics = [], scalar_prefetch = 0 : i64, scratch_operands = 0 : i64, tpu.core_type = #tpu.core_type<tc>} {
    %c0 = arith.constant 0 : index
    %c0_0 = arith.constant 0 : index
    %0 = vector.load %arg0[%c0, %c0_0] : memref<16x12xf32, #tpu.memory_space<vmem>>, vector<16x12xf32>
    %c0_1 = arith.constant 0 : index
    %c0_2 = arith.constant 0 : index
    %1 = vector.load %arg1[%c0_1, %c0_2] : memref<12x128xf32, #tpu.memory_space<vmem>>, vector<12x128xf32>
    %cst = arith.constant dense<0.000000e+00> : vector<16x128xf32>
    %2 = tpu.matmul %0, %1, %cst {dimension_numbers = #tpu.dot_dimension_numbers<[1], [0], [0], [1], [0, 0, 1, 1], [], []>} : vector<16x12xf32>, vector<12x128xf32>, vector<16x128xf32> -> vector<16x128xf32>
    %c0_3 = arith.constant 0 : index
    %c0_4 = arith.constant 0 : index
    %3 = vector.load %arg2[%c0_3, %c0_4] : memref<1x128xf32, #tpu.memory_space<vmem>>, vector<1x128xf32>
    %4 = vector.broadcast %3 : vector<1x128xf32> to vector<16x128xf32>
    %5 = arith.addf %2, %4 : vector<16x128xf32>
    %cst_5 = arith.constant 0.000000e+00 : f32
    %6 = vector.broadcast %cst_5 : f32 to vector<16x128xf32>
    %7 = arith.maximumf %5, %6 : vector<16x128xf32>
    %c0_6 = arith.constant 0 : index
    %c0_7 = arith.constant 0 : index
    %8 = vector.load %arg8[%c0_6, %c0_7] : memref<16x128xf32, #tpu.memory_space<vmem>>, vector<16x128xf32>
    tpu.vector_store %arg8[%c0_6, %c0_7], %7 {strides = array<i32>} : memref<16x128xf32, #tpu.memory_space<vmem>>, vector<16x128xf32>,
    %c0_8 = arith.constant 0 : index
    %c0_9 = arith.constant 0 : index
    %9 = vector.load %arg3[%c0_8, %c0_9] : memref<2x16xf32, #tpu.memory_space<vmem>>, vector<2x16xf32>
    %c0_10 = arith.constant 0 : index
    %c0_11 = arith.constant 0 : index
    %10 = vector.load %arg4[%c0_10, %c0_11] : memref<16x384xf32, #tpu.memory_space<vmem>>, vector<16x384xf32>
    %cst_12 = arith.constant dense<0.000000e+00> : vector<2x384xf32>
    %11 = tpu.matmul %9, %10, %cst_12 {dimension_numbers = #tpu.dot_dimension_numbers<[1], [0], [0], [1], [0, 0, 1, 1], [], []>} : vector<2x16xf32>, vector<16x384xf32>, vector<2x384xf32> -> vector<2x384xf32>
    %c0_13 = arith.constant 0 : index
    %c0_14 = arith.constant 0 : index
    %12 = vector.load %arg5[%c0_13, %c0_14] : memref<1x384xf32, #tpu.memory_space<vmem>>, vector<1x384xf32>
    %13 = vector.broadcast %12 : vector<1x384xf32> to vector<2x384xf32>
    %14 = arith.addf %11, %13 : vector<2x384xf32>
    %15 = vector.extract_strided_slice %14 {offsets = [0, 0], sizes = [2, 128], strides = [1, 1]} : vector<2x384xf32> to vector<2x128xf32>
    %16 = arith.negf %15 : vector<2x128xf32>
    %17 = math.exp %16 : vector<2x128xf32>
    %cst_15 = arith.constant 1.000000e+00 : f32
    %18 = vector.broadcast %cst_15 : f32 to vector<2x128xf32>
    %19 = arith.addf %18, %17 : vector<2x128xf32>
    %20 = arith.divf %18, %19 : vector<2x128xf32>
    %21 = vector.extract_strided_slice %14 {offsets = [0, 128], sizes = [2, 128], strides = [1, 1]} : vector<2x384xf32> to vector<2x128xf32>
    %22 = math.tanh %21 : vector<2x128xf32>
    %23 = vector.extract_strided_slice %14 {offsets = [0, 256], sizes = [2, 128], strides = [1, 1]} : vector<2x384xf32> to vector<2x128xf32>
    %24 = arith.negf %23 : vector<2x128xf32>
    %25 = math.exp %24 : vector<2x128xf32>
    %cst_16 = arith.constant 1.000000e+00 : f32
    %26 = vector.broadcast %cst_16 : f32 to vector<2x128xf32>
    %27 = arith.addf %26, %25 : vector<2x128xf32>
    %28 = arith.divf %26, %27 : vector<2x128xf32>
    %29 = arith.mulf %20, %22 : vector<2x128xf32>
    %30 = math.tanh %29 : vector<2x128xf32>
    %31 = arith.mulf %28, %30 : vector<2x128xf32>
    %c0_17 = arith.constant 0 : index
    %c0_18 = arith.constant 0 : index
    %32 = vector.load %arg6[%c0_17, %c0_18] : memref<128x128xf32, #tpu.memory_space<vmem>>, vector<128x128xf32>
    %cst_19 = arith.constant dense<0.000000e+00> : vector<2x128xf32>
    %33 = tpu.matmul %31, %32, %cst_19 {dimension_numbers = #tpu.dot_dimension_numbers<[1], [0], [0], [1], [0, 0, 1, 1], [], []>} : vector<2x128xf32>, vector<128x128xf32>, vector<2x128xf32> -> vector<2x128xf32>
    %c0_20 = arith.constant 0 : index
    %c0_21 = arith.constant 0 : index
    %34 = vector.load %arg7[%c0_20, %c0_21] : memref<1x128xf32, #tpu.memory_space<vmem>>, vector<1x128xf32>
    %35 = vector.broadcast %34 : vector<1x128xf32> to vector<2x128xf32>
    %36 = arith.addf %33, %35 : vector<2x128xf32>
    %c0_22 = arith.constant 0 : index
    %c0_23 = arith.constant 0 : index
    %37 = vector.load %arg9[%c0_22, %c0_23] : memref<2x128xf32, #tpu.memory_space<vmem>>, vector<2x128xf32>
    tpu.vector_store %arg9[%c0_22, %c0_23], %36 {strides = array<i32>} : memref<2x128xf32, #tpu.memory_space<vmem>>, vector<2x128xf32>,
    return
  }
}

</mosaic_0001>

<bundles_post_ra>
// kernel: dual_temporal_graph_learning.1
= control target key start
LH: loop header
LB: loop body
LE: loop exit
PB: predicated region body
PF: predicated region fallthrough
CT: control target
= control target key end

     0   :  { %15 = vsyncpa [#allocation3], 0  ;;  %s832_s0 = inlined_call_operand.vmem [shape: f32[16,12], index: 0, kind: input, shape index: {}]   ;;  %s833_s1 = inlined_call_operand.hbm [shape: f32[12,128], index: 1, kind: input, shape index: {}]   ;;  %s834_s2 = inlined_call_operand.vmem [shape: f32[1,128], index: 2, kind: input, shape index: {}]   ;;  %s835_s3 = inlined_call_operand.vmem [shape: f32[2,16], index: 3, kind: input, shape index: {}]   ;;  %s836_s4 = inlined_call_operand.hbm [shape: f32[16,384], index: 4, kind: input, shape index: {}]   ;;  %s837_s5 = inlined_call_operand.vmem [shape: f32[1,384], index: 5, kind: input, shape index: {}]   ;;  %s838_s6 = inlined_call_operand.vmem [shape: f32[128,128], index: 6, kind: input, shape index: {}]   ;;  %s839_s7 = inlined_call_operand.vmem [shape: f32[1,128], index: 7, kind: input, shape index: {}]   ;;  %s840_s8 = inlined_call_operand.hbm [shape: f32[16,128], index: 8, kind: output, shape index: {0}]   ;;  %s841_s9 = inlined_call_operand.hbm [shape: f32[2,128], index: 9, kind: output, shape index: {1}]  }
   0x1   :  { %16 = vsyncpa [#allocation6], 0 }
   0x2   :  { %17 = vsyncpa [#allocation4], 0 }
   0x3   :  { %18 = vsyncpa [#allocation9], 0  ;;  %s665_s30 = smov [#allocation2]  }
   0x4   :  { %s26_s10 = sshll.u32 %s665_s30, 4  ;;  %s27_s10 = int_to_ptr.vmem [resolvable:$true] %s26_s10 }
   0x5   :  { %s585_s11 = scalar_lea.vmem %s27_s10, 256  ;;  %p590_p1 = scmp.lt.s32.totalorder %s27_s10, %s27_s10 }
   0x6   :  { %p586_p0 = scmp.ne.s32.totalorder %s27_s10, %s585_s11  ;;  %p591_p2 = scmp.lt.s32.totalorder %s585_s11, %s585_s11 }
   0x8   :  { %p592_p3 = por %p591_p2, %p590_p1 }
   0xa   :  { %p593_p4 = pnand %p592_p3, %p586_p0 }
   0xc   :  { %596 = shalt.err (!%p593_p4)
}
   0xd   :  { %s666_s12 = smov 128   ;;  %s667_s13 = smov 8  }
   0xe   :  { %32 = dma.hbm_to_vmem [thread:$0]  %s833_s1, 256, %s27_s10, [#allocation3], %s666_s12, %s666_s12, %s667_s13  }
   0xf   :  { %s668_s16 = smov [#allocation5]  }
  0x10   :  { %s42_s17 = sshll.u32 %s668_s16, 4  ;;  %s43_s17 = int_to_ptr.vmem [resolvable:$true] %s42_s17 }
  0x11   :  { %s605_s18 = scalar_lea.vmem %s43_s17, 768  ;;  %p610_p6 = scmp.lt.s32.totalorder %s43_s17, %s43_s17 }
  0x12   :  { %p606_p5 = scmp.ne.s32.totalorder %s43_s17, %s605_s18  ;;  %p611_p7 = scmp.lt.s32.totalorder %s605_s18, %s605_s18 }
  0x14   :  { %p612_p8 = por %p611_p7, %p610_p6 }
  0x16   :  { %p613_p9 = pnand %p612_p8, %p606_p5 }
  0x18   :  { %616 = shalt.err (!%p613_p9)
}
  0x19   :  { %s669_s19 = smov 384   ;;  %s670_s20 = smov 24  }
  0x1a   :  { %48 = dma.hbm_to_vmem [thread:$0]  %s836_s4, 768, %s43_s17, [#allocation6], %s669_s19, %s669_s19, %s670_s20  }
  0x1b   :  { %657 = dma.done.wait [#allocation3], 256  }
  0x1c   :  { %658 = vsyncadd [#allocation3], 4294967040 }
  0x1d   :  { %659 = dma.done.wait [#allocation6], 768  }
  0x1e   :  { %660 = vsyncadd [#allocation6], 4294966528  ;;  %v671_v0 = vmov 0.0   ;;  %vm672_vm0 = vmmov 0   ;;  %vm79_vm1 = vcmask 1043456   ;;  %vm72_vm2 = vcmask 97280  }
  0x1f   :  { %520 = vmatprep.subr.mxu1 %v671_v0  ;;  %552 = vmatprep.mubr.msk.f32.mxu1 %vm672_vm0, %v671_v0  ;;  %v64_v1 = vld [vmem:[#allocation2 + $0x8] sm:$0xf]  ;;  %v63_v2 = vld [vmem:[#allocation2] sm:$0xff]  ;;  %v167_v5 = vld [vmem:[#allocation5 + $0x20] sm:$0xff]  ;;  %vm186_vm3 = vcmask 130048   ;;  %v171_v28 = vlaneseq }
  0x20   :  { %v61_v3 = vld [vmem:[%s832_s0] sm:$0xff]  ;;  %506 = vmatprep.subr.msk.mxu0 %vm79_vm1, %v64_v1  ;;  %v62_v4 = vld [vmem:[%s832_s0 + $0x8] sm:$0xff]  ;;  %v164_v7 = vld [vmem:[#allocation5 + $0x8] sm:$0xff] }
  0x21   :  { %510 = vmatprep.mubr.msk.f32.mxu0 %vm72_vm2, %v61_v3  ;;  %507 = vmatpush3.msk.msra.mxu0 %vm79_vm1, %v64_v1  ;;  %v166_v6 = vld [vmem:[#allocation5 + $0x18] sm:$0xff]  ;;  %v163_v8 = vld [vmem:[#allocation5] sm:$0xff]  ;;  %v162_v9 = vld [vmem:[%s835_s3] sm:$0x3]  ;;  %v172_v29 = vshrl.u32 %v171_v28, 7 }
  0x22   :  { %508 = vmatprep.subr.mxu0 %v63_v2  ;;  %v168_v10 = vld [vmem:[#allocation5 + $0x28] sm:$0xff]  ;;  %v165_v11 = vld [vmem:[#allocation5 + $0x10] sm:$0xff]  ;;  %v361_v13 = vld [vmem:[%s838_s6 + $0x70] sm:$0xff] }
  0x23   :  { %509 = vmatpush3.msra.mxu0 %v63_v2  ;;  %v362_v12 = vld [vmem:[%s838_s6 + $0x78] sm:$0xff]  ;;  %v360_v14 = vld [vmem:[%s838_s6 + $0x68] sm:$0xff]  ;;  %v359_v15 = vld [vmem:[%s838_s6 + $0x60] sm:$0xff]  ;;  %v173_v30 = vsub.s32 0, %v172_v29  ;;  %v181_v39 = vsub.s32 2, %v172_v29  ;;  %v177_v49 = vsub.s32 1, %v172_v29 }
  0x24   :  { %511 = vmatmul.mubr.msk.f32.vlgmr.msra.gmra.mxu0 %vm72_vm2, %v62_v4  ;;  %218 = vmatprep.subr.mxu0 %v167_v5  ;;  %v358_v16 = vld [vmem:[%s838_s6 + $0x58] sm:$0xff]  ;;  %v357_v17 = vld [vmem:[%s838_s6 + $0x50] sm:$0xff]  ;;  %v356_v18 = vld [vmem:[%s838_s6 + $0x48] sm:$0xff] }
  0x25   :  { %219 = vmatpush1.msra.mxu0 %v166_v6  ;;  %254 = vmatprep.mubr.f32.mxu0 %v671_v0  ;;  %v355_v19 = vld [vmem:[%s838_s6 + $0x40] sm:$0xff]  ;;  %v354_v20 = vld [vmem:[%s838_s6 + $0x38] sm:$0xff]  ;;  %v353_v21 = vld [vmem:[%s838_s6 + $0x30] sm:$0xff] }
  0x26   :  { %220 = vmatprep.subr.mxu0 %v164_v7  ;;  %521 = vmatpush3.msra.mxu1 %v362_v12  ;;  %v352_v22 = vld [vmem:[%s838_s6 + $0x28] sm:$0xff]  ;;  %v351_v23 = vld [vmem:[%s838_s6 + $0x20] sm:$0xff]  ;;  %v350_v24 = vld [vmem:[%s838_s6 + $0x18] sm:$0xff] }
  0x27   :  { %221 = vmatpush1.msra.mxu0 %v163_v8  ;;  %522 = vmatprep.subr.mxu1 %v671_v0  ;;  %v349_v25 = vld [vmem:[%s838_s6 + $0x10] sm:$0xff]  ;;  %v348_v26 = vld [vmem:[%s838_s6 + $0x8] sm:$0xff]  ;;  %v347_v27 = vld [vmem:[%s838_s6] sm:$0xff] }
  0x28   :  { %477 = vmatmul.mubr.msk.f32.vlgmr.msra.gmra.mxu0 %vm186_vm3, %v162_v9  ;;  %513 = vmatprep.subr.mxu0 %v671_v0  ;;  %v473_v31 = vld [vmem:[%s834_s2] ss:$0 sm:$0xff]  ;;  %s673_s2 = smov [#allocation7]  }
  0x29   :  { %514 = vmatpush3.msra.mxu0 %v168_v10  ;;  %517 = vmatprep.mubr.msk.f32.mxu0 %vm672_vm0, %v671_v0  ;;  %v169_v32 = vld [vmem:[%s837_s5] sm:$0x7]  ;;  %s446_s5 = sshll.u32 %s673_s2, 4  ;;  %s447_s5 = int_to_ptr.vmem [resolvable:$true] %s446_s5 }
  0x2a   :  { %515 = vmatprep.subr.mxu0 %v671_v0  ;;  %523 = vmatpush3.msra.mxu1 %v361_v13  ;;  %v174_v35 = vrot.slane %v169_v32, %v173_v30  ;;  %v182_v45 = vrot.slane %v169_v32, %v181_v39  ;;  %v178_v51 = vrot.slane %v169_v32, %v177_v49  ;;  %s617_s6 = scalar_lea.vmem %s447_s5, 256  ;;  %p622_p11 = scmp.lt.s32.totalorder %s447_s5, %s447_s5 }
  0x2b   :  { %516 = vmatpush3.msra.mxu0 %v165_v11  ;;  %524 = vmatprep.subr.mxu1 %v671_v0  ;;  %p618_p10 = scmp.ne.s32.totalorder %s447_s5, %s617_s6  ;;  %p623_p12 = scmp.lt.s32.totalorder %s617_s6, %s617_s6 }
  0x2c   :  { %518 = vmatmul.mubr.msk.f32.vlgmr.msra.gmra.mxu0 %vm186_vm3, %v162_v9  ;;  %525 = vmatpush3.msra.mxu1 %v360_v14 }
  0x2d   :  { %526 = vmatprep.subr.mxu1 %v671_v0  ;;  %p624_p13 = por %p623_p12, %p622_p11 }
  0x2e   :  { %527 = vmatpush3.msra.mxu1 %v359_v15 }
  0x2f   :  { %528 = vmatprep.subr.mxu1 %v671_v0  ;;  %p625_p0 = pnand %p624_p13, %p618_p10 }
  0x30   :  { %529 = vmatpush3.msra.mxu1 %v358_v16 }
  0x31   :  { %530 = vmatprep.subr.mxu1 %v671_v0 }
  0x32   :  { %531 = vmatpush3.msra.mxu1 %v357_v17 }
  0x33   :  { %532 = vmatprep.subr.mxu1 %v671_v0 }
  0x34   :  { %533 = vmatpush3.msra.mxu1 %v356_v18 }
  0x35   :  { %534 = vmatprep.subr.mxu1 %v671_v0 }
  0x36   :  { %535 = vmatpush3.msra.mxu1 %v355_v19 }
  0x37   :  { %536 = vmatprep.subr.mxu1 %v671_v0 }
  0x38   :  { %537 = vmatpush3.msra.mxu1 %v354_v20 }
  0x39   :  { %538 = vmatprep.subr.mxu1 %v671_v0 }
  0x3a   :  { %539 = vmatpush3.msra.mxu1 %v353_v21 }
  0x3b   :  { %540 = vmatprep.subr.mxu1 %v671_v0 }
  0x3c   :  { %541 = vmatpush3.msra.mxu1 %v352_v22 }
  0x3d   :  { %542 = vmatprep.subr.mxu1 %v671_v0 }
  0x3e   :  { %543 = vmatpush3.msra.mxu1 %v351_v23 }
  0x3f   :  { %544 = vmatprep.subr.mxu1 %v671_v0 }
  0x40   :  { %545 = vmatpush3.msra.mxu1 %v350_v24 }
  0x41   :  { %546 = vmatprep.subr.mxu1 %v671_v0 }
  0x42   :  { %547 = vmatpush3.msra.mxu1 %v349_v25 }
  0x43   :  { %548 = vmatprep.subr.mxu1 %v671_v0 }
  0x44   :  { %549 = vmatpush3.msra.mxu1 %v348_v26 }
  0x45   :  { %550 = vmatprep.subr.mxu1 %v671_v0 }
  0x46   :  { %551 = vmatpush3.msra.mxu1 %v347_v27 }
  0xe4   :  { %v512_v33 = vpop.f32.mrf.mxu0 }
  0xe5   :  { %v155_v34 = vadd.f32 %v512_v33, %v473_v31 }
  0xe6   :  { %v149_v36 = vpop.f32.mrf.mxu0 }
  0xe7   :  { %v159_v37 = vmax.f32 %v155_v34, 0.0  ;;  %v150_v38 = vadd.f32 %v473_v31, %v149_v36 }
  0xe8   :  { %v256_v40 = vpop.f32.mrf.mxu0 }
  0xe9   :  { %161 = vst [vmem:[#allocation7 + $0x8] sm:$0xff] %v159_v37  ;;  %v158_v41 = vmax.f32 %v150_v38, 0.0  ;;  %v257_v42 = vadd.f32 %v256_v40, %v174_v35 }
  0xea   :  { %v258_v43 = vpop.f32.mrf.mxu0 }
  0xeb   :  { %160 = vst [vmem:[#allocation7] sm:$0xff] %v158_v41  ;;  %v479_v44 = vmul.f32 -1.442695, %v257_v42  ;;  %v259_v52 = vadd.f32 %v258_v43, %v178_v51 }
  0xec   :  { %v327_v46 = vpop.f32.mrf.mxu0 }
  0xed   :  { %565 = vpow2.f32 %v479_v44  ;;  %v328_v48 = vadd.f32 %v327_v46, %v182_v45 }
  0xee   :  { %v519_v47 = vpop.f32.mrf.mxu0 }
  0xef   :  { %v480_v50 = vmul.f32 -1.442695, %v328_v48 }
  0xf1   :  { %567 = vpow2.f32 %v480_v50 }
  0xf2   :  { %569 = vtanh.f32 %v259_v52 }
  0xfa   :  { %v566_v53 = vpop.eup %565 }
  0xfb   :  { %v334_v54 = vadd.f32 1.0, %v566_v53 }
  0xfd   :  { %571 = vrcp.f32 %v334_v54 }
  0xfe   :  { %v568_v55 = vpop.eup %567 }
  0xff   :  { %v341_v56 = vadd.f32 1.0, %v568_v55  ;;  %v570_v57 = vpop.eup %569 }
 0x101   :  { %573 = vrcp.f32 %v341_v56 }
 0x10a   :  { %v572_v58 = vpop.eup %571 }
 0x10b   :  { %v344_v59 = vmul.f32 %v572_v58, %v570_v57 }
 0x10d   :  { %575 = vtanh.f32 %v344_v59 }
 0x10e   :  { %v574_v60 = vpop.eup %573 }
 0x11a   :  { %v576_v61 = vpop.eup %575 }
 0x11b   :  { %v346_v62 = vmul.f32 %v576_v61, %v574_v60 }
 0x11d   :  { %553 = vmatmul.mubr.f32.vlgmr.msra.gmra.mxu1 %v346_v62 }
 0x11e   :  { %628 = shalt.err (!%p625_p0)
}
 0x11f   :  { %452 = dma.vmem_to_hbm [thread:$0]  %s447_s5, 256, %s840_s8, [#allocation4], %s666_s12, %s666_s12, %s667_s13  }
 0x120   :  { %v481_v63 = vld [vmem:[%s839_s7] ss:$0 sm:$0xff]  ;;  %s674_s1 = smov [#allocation8]  }
 0x121   :  { %s459_s23 = sshll.u32 %s674_s1, 4  ;;  %s460_s23 = int_to_ptr.vmem [resolvable:$true] %s459_s23 }
 0x122   :  { %s637_s4 = scalar_lea.vmem %s460_s23, 32  ;;  %p642_p2 = scmp.lt.s32.totalorder %s460_s23, %s460_s23 }
 0x123   :  { %p638_p1 = scmp.ne.s32.totalorder %s460_s23, %s637_s4  ;;  %p643_p3 = scmp.lt.s32.totalorder %s637_s4, %s637_s4 }
 0x125   :  { %p644_p4 = por %p643_p3, %p642_p2 }
 0x127   :  { %p645_p5 = pnand %p644_p4, %p638_p1 }
 0x1dd   :  { %v436_v0 = vpop.f32.mrf.mxu1 }
 0x1de   :  { %v437_v1 = vadd.f32 %v481_v63, %v436_v0 }
 0x1df   :  { %v554_v2 = vpop.f32.mrf.mxu1 }
 0x1e0   :  { %440 = vst [vmem:[#allocation8] sm:$0x3] %v437_v1 }
 0x1e1   :  { %648 = shalt.err (!%p645_p5)
}
 0x1e2   :  { %462 = dma.vmem_to_hbm [thread:$0]  %s460_s23, 32, %s841_s9, [#allocation9]  }
 0x1e3   :  { %661 = dma.done.wait [#allocation4], 256  }
 0x1e4   :  { %662 = vsyncadd [#allocation4], 4294967040 }
 0x1e5   :  { %663 = dma.done.wait [#allocation9], 32  }
 0x1e6   :  { %664 = vsyncadd [#allocation9], 4294967264 }
 0x1e7   :  { %469 = vsyncpa [#allocation3], 1 }
 0x1e8   :  { %470 = vsyncpa [#allocation6], 1 }
 0x1e9   :  { %471 = vsyncpa [#allocation4], 1 }
 0x1ea   :  { %472 = vsyncpa [#allocation9], 1 }

</bundles_post_ra>
